<compile_context>
chip_gen: v5e
topology: v5e:2x2
jax: 0.10.0
libtpu: 0.0.40
codegen_flags: <defaults>
</compile_context>

<pallas_src>
import jax
import jax.numpy as jnp
from jax.experimental import pallas as pl
from jax.experimental.pallas import tpu as pltpu


_LANES = 128                        # TPU vreg lane width (last dim multiple)
_SUBLANES = 8                       # sublane granularity for row tiles
_MAX_TILE_BYTES = 2 * 1024 * 1024   # ~2 MiB per VMEM buffer


def _round_up(a: int, b: int) -> int:
    return ((a + b - 1) // b) * b


def _identity_copy_kernel(x_ref, o_ref):
    # Pure pass-through: encoder output == input.
    o_ref[...] = x_ref[...]


def base_encoder_forward(x, attn_mask=None):
    """Concrete BaseEncoder forward (identity encoder).

    Args:
      x: jnp.ndarray of any shape, e.g. (B, S, H).
      attn_mask: unused -- the abstract base defines no attention computation.

    Returns:
      (encoder_output, attn_weights) where encoder_output == x and
      attn_weights is None.
    """
    del attn_mask  # No attention is defined by the abstract base.

    orig_shape = x.shape
    total = x.size
    itemsize = jnp.dtype(x.dtype).itemsize

    # ---- Lane-dense 2D layout: flatten, pad so last dim == 128 lanes -------
    rows_needed = -(-total // _LANES)
    max_tile_rows = max(
        _SUBLANES,
        (_MAX_TILE_BYTES // (_LANES * itemsize)) // _SUBLANES * _SUBLANES,
    )
    tile_rows = min(max_tile_rows, _round_up(rows_needed, _SUBLANES))
    rows = _round_up(rows_needed, tile_rows)
    pad = rows * _LANES - total

    flat = x.reshape(-1)
    if pad:
        flat = jnp.pad(flat, (0, pad))
    x2d = flat.reshape(rows, _LANES)

    grid = (rows // tile_rows,)

    out2d = pl.pallas_call(
        _identity_copy_kernel,
        out_shape=jax.ShapeDtypeStruct((rows, _LANES), x.dtype),
        grid=grid,
        in_specs=[pl.BlockSpec((tile_rows, _LANES), lambda i: (i, 0))],
        out_specs=pl.BlockSpec((tile_rows, _LANES), lambda i: (i, 0)),
        input_output_aliases={0: 0},  # output aliases the padded input buffer
        compiler_params=pltpu.CompilerParams(
            dimension_semantics=("parallel",),
        ),
        cost_estimate=pl.CostEstimate(
            flops=0,
            transcendentals=0,
            bytes_accessed=2 * rows * _LANES * itemsize,
        ),
    )(x2d)

    out = out2d.reshape(-1)[:total].reshape(orig_shape)

    # Abstract base defines no attention computation -> no attention weights.
    return out, None


if __name__ == "__main__":
    key = jax.random.PRNGKey(0)
    B, S, H = 2, 8, 32
    x = jax.random.normal(key, (B, S, H), dtype=jnp.float32)

    out, attn = base_encoder_forward(x, attn_mask=None)
    out = jax.block_until_ready(out)

    assert out.shape == (B, S, H)
    assert out.dtype == x.dtype
    assert attn is None
    assert bool(jnp.array_equal(out, x)), "identity encoder output mismatch"

    print("KERNEL_OK")
</pallas_src>

<mosaic_0001>
module attributes {stable_mosaic.version = 11 : i64} {
  func.func @_identity_copy_kernel(%arg0: i32, %arg1: memref<8x128xf32, #tpu.memory_space<vmem>>, %arg2: memref<8x128xf32, #tpu.memory_space<vmem>>) attributes {dimension_semantics = [#tpu.dimension_semantics<parallel>], iteration_bounds = array<i64: 1>, scalar_prefetch = 0 : i64, scratch_operands = 0 : i64, tpu.core_type = #tpu.core_type<tc>, window_params = [{transform_indices = @transform_0, window_bounds = array<i64: 8, 128>}, {transform_indices = @transform_1, window_bounds = array<i64: 8, 128>}]} {
    %c0 = arith.constant 0 : index
    %c0_0 = arith.constant 0 : index
    %0 = vector.load %arg1[%c0, %c0_0] : memref<8x128xf32, #tpu.memory_space<vmem>>, vector<8x128xf32>
    %c0_1 = arith.constant 0 : index
    %c0_2 = arith.constant 0 : index
    %1 = vector.load %arg2[%c0_1, %c0_2] : memref<8x128xf32, #tpu.memory_space<vmem>>, vector<8x128xf32>
    tpu.vector_store %arg2[%c0_1, %c0_2], %0 {strides = array<i32>} : memref<8x128xf32, #tpu.memory_space<vmem>>, vector<8x128xf32>,
    return
  }
  func.func @transform_0(%arg0: i32) -> (i32, i32) {
    %c0_i32 = arith.constant 0 : i32
    %c0_i32_0 = arith.constant 0 : i32
    return %arg0, %c0_i32 : i32, i32
  }
  func.func @transform_1(%arg0: i32) -> (i32, i32) {
    %c0_i32 = arith.constant 0 : i32
    %c0_i32_0 = arith.constant 0 : i32
    return %arg0, %c0_i32 : i32, i32
  }
}

</mosaic_0001>

<bundles_post_ra>
// kernel: tpu_custom_call.1
= control target key start
LH: loop header
LB: loop body
LE: loop exit
PB: predicated region body
PF: predicated region fallthrough
CT: control target
= control target key end

     0   :  { %6 = vsyncpa [#allocation3], 0  ;;  %s114_s0 = inlined_call_operand.hbm [shape: f32[8,128], index: 0, kind: input, shape index: {}, may-alias: {0,1}]   ;;  %s115_s1 = inlined_call_operand.hbm [shape: f32[8,128], index: 1, kind: output, shape index: {}, may-alias: {0,1}]  }
   0x1   :  { %7 = vsyncpa [#allocation4], 0  ;;  %s13_s8 = sshll.u32 %s114_s0, 4  ;;  %s96_s9 = smov [#allocation2]   ;;  %s14_s8 = int_to_ptr.hbm [resolvable:$true] %s13_s8 }
   0x2   :  { %s15_s10 = sshll.u32 %s96_s9, 4  ;;  %s16_s10 = int_to_ptr.vmem [resolvable:$true] %s15_s10 }
   0x3   :  { %18 = dma.hbm_to_vmem [thread:$0]  %s14_s8, 128, %s16_s10, [#allocation3]  }
   0x4   :  { %92 = dma.done.wait [#allocation3], 128  }
   0x5   :  { %93 = vsyncadd [#allocation3], 4294967168  ;;  %s97_s11 = smov [#allocation5]   ;;  %s32_s15 = sshll.u32 %s115_s1, 4  ;;  %v23_v0 = vld [vmem:[#allocation2] sm:$0xff]  ;;  %s33_s15 = int_to_ptr.hbm [resolvable:$true] %s32_s15 }
   0x6   :  { %s30_s12 = sshll.u32 %s97_s11, 4  ;;  %24 = vst [vmem:[#allocation5] sm:$0xff] %v23_v0  ;;  %s31_s12 = int_to_ptr.vmem [resolvable:$true] %s30_s12 }
   0x7   :  { %35 = dma.vmem_to_hbm [thread:$0]  %s31_s12, 128, %s33_s15, [#allocation4]  }
   0x8   :  { %94 = dma.done.wait [#allocation4], 128  }
   0x9   :  { %95 = vsyncadd [#allocation4], 4294967168 }
   0xa   :  { %40 = vsyncpa [#allocation3], 1 }
   0xb   :  { %41 = vsyncpa [#allocation4], 1 }

</bundles_post_ra>
